<compile_context>
chip_gen: v5e
topology: v5e:2x2
jax: 0.10.0
libtpu: 0.0.40
codegen_flags: <defaults>
</compile_context>

<pallas_src>
import jax
import jax.numpy as jnp
import numpy as np
from jax.experimental import pallas as pl
from jax.experimental.pallas import tpu as pltpu


# ----------------------------------------------------------------------------
# Pallas kernel: both Q-heads in three fused matmuls.
# xu_ref carries an appended ones column; every fused weight matrix carries a
# pass-through column so the "1" survives each layer and supplies the bias of
# the next layer (relu(1) == 1).
# ----------------------------------------------------------------------------
def td3_critic_kernel(xu_ref, w1_ref, w2_ref, w3_ref, out_ref):
    h = jnp.maximum(
        jnp.dot(xu_ref[...], w1_ref[...], preferred_element_type=jnp.float32), 0.0)
    h = jnp.maximum(
        jnp.dot(h, w2_ref[...], preferred_element_type=jnp.float32), 0.0)
    out_ref[...] = jnp.dot(h, w3_ref[...], preferred_element_type=jnp.float32)


# ----------------------------------------------------------------------------
# One-time parameter preparation (hoisted out of the forward path).
# params: PyTorch-convention weights wK (out, in) and biases bK (out,).
# ----------------------------------------------------------------------------
def prepare_td3_params(params):
    h1, in_dim = params["w1"].shape
    h2 = params["w2"].shape[0]

    # Layer 1 fused: (in+1, 2*h1+1); last row = biases, last col = ones carrier.
    w1f = jnp.zeros((in_dim + 1, 2 * h1 + 1), jnp.float32)
    w1f = w1f.at[:in_dim, :h1].set(params["w1"].T.astype(jnp.float32))
    w1f = w1f.at[:in_dim, h1:2 * h1].set(params["w4"].T.astype(jnp.float32))
    w1f = w1f.at[in_dim, :h1].set(params["b1"].astype(jnp.float32))
    w1f = w1f.at[in_dim, h1:2 * h1].set(params["b4"].astype(jnp.float32))
    w1f = w1f.at[in_dim, 2 * h1].set(1.0)

    # Layer 2 fused block-diagonal: (2*h1+1, 2*h2+1).
    w2f = jnp.zeros((2 * h1 + 1, 2 * h2 + 1), jnp.float32)
    w2f = w2f.at[:h1, :h2].set(params["w2"].T.astype(jnp.float32))
    w2f = w2f.at[h1:2 * h1, h2:2 * h2].set(params["w5"].T.astype(jnp.float32))
    w2f = w2f.at[2 * h1, :h2].set(params["b2"].astype(jnp.float32))
    w2f = w2f.at[2 * h1, h2:2 * h2].set(params["b5"].astype(jnp.float32))
    w2f = w2f.at[2 * h1, 2 * h2].set(1.0)

    # Layer 3 fused: (2*h2+1, 2) -> q1 in column 0, q2 in column 1.
    w3f = jnp.zeros((2 * h2 + 1, 2), jnp.float32)
    w3f = w3f.at[:h2, 0].set(params["w3"][0].astype(jnp.float32))
    w3f = w3f.at[h2:2 * h2, 1].set(params["w6"][0].astype(jnp.float32))
    w3f = w3f.at[2 * h2, 0].set(params["b3"][0].astype(jnp.float32))
    w3f = w3f.at[2 * h2, 1].set(params["b6"][0].astype(jnp.float32))

    return {"w1f": w1f, "w2f": w2f, "w3f": w3f}


# ----------------------------------------------------------------------------
# Forward wrapper: concat (glue) + ones column, then one pallas_call.
# ----------------------------------------------------------------------------
def td3_critic_forward(state, action, packed):
    B = state.shape[0]
    xu = jnp.concatenate(
        [state.astype(jnp.float32), action.astype(jnp.float32),
         jnp.ones((B, 1), jnp.float32)], axis=1)

    w1f, w2f, w3f = packed["w1f"], packed["w2f"], packed["w3f"]
    in_aug = xu.shape[1]

    # Batch tiling: weights stay resident as full-array blocks across the grid.
    # NOTE: at hidden>=256 / very large B, cast matmul operands to bf16 on
    # v6e/v7x and size TILE_B against v7x's 64 MiB VMEM.  Not needed here.
    if B >= 256:
        tile_b = 256
    else:
        tile_b = max(8, -(-B // 8) * 8)        # round B up to a multiple of 8
    b_pad = -(-B // tile_b) * tile_b
    if b_pad != B:
        xu = jnp.pad(xu, ((0, b_pad - B), (0, 0)))
    grid = (b_pad // tile_b,)

    out = pl.pallas_call(
        td3_critic_kernel,
        out_shape=jax.ShapeDtypeStruct((b_pad, 2), jnp.float32),
        grid=grid,
        in_specs=[
            pl.BlockSpec((tile_b, in_aug), lambda i: (i, 0)),
            pl.BlockSpec(w1f.shape, lambda i: (0, 0)),
            pl.BlockSpec(w2f.shape, lambda i: (0, 0)),
            pl.BlockSpec(w3f.shape, lambda i: (0, 0)),
        ],
        out_specs=pl.BlockSpec((tile_b, 2), lambda i: (i, 0)),
        compiler_params=pltpu.CompilerParams(
            dimension_semantics=("parallel",)),   # shards batch across v7x TCs
    )(xu, w1f, w2f, w3f)

    q1 = out[:B, 0:1]
    q2 = out[:B, 1:2]
    return q1, q2


# ----------------------------------------------------------------------------
# Deterministic parameter initialization mirroring the PyTorch module:
#   l1/l2/l4/l5 weights ~ fanin_init (uses size[0] = out_features as fanin,
#   per the reference code); l3/l6 weights ~ uniform(-init_w, +init_w);
#   biases keep nn.Linear default: uniform(-1/sqrt(in), +1/sqrt(in)).
# ----------------------------------------------------------------------------
def init_td3_params(key, state_dim, action_dim, h1, h2, init_w=0.003):
    in_dim = state_dim + action_dim
    layer_shapes = {
        1: (h1, in_dim), 2: (h2, h1), 3: (1, h2),
        4: (h1, in_dim), 5: (h2, h1), 6: (1, h2),
    }
    params = {}
    keys = jax.random.split(key, 12)
    for idx, (k, (out_f, in_f)) in enumerate(layer_shapes.items()):
        wv = init_w if k in (3, 6) else 1.0 / np.sqrt(out_f)
        bv = 1.0 / np.sqrt(in_f)
        params[f"w{k}"] = jax.random.uniform(
            keys[2 * idx], (out_f, in_f), jnp.float32, minval=-wv, maxval=wv)
        params[f"b{k}"] = jax.random.uniform(
            keys[2 * idx + 1], (out_f,), jnp.float32, minval=-bv, maxval=bv)
    return params


def reference_forward(state, action, params):
    """Plain-JAX reference of the PyTorch forward for validation."""
    xu = jnp.concatenate([state, action], axis=1)

    def head(a, b, c):
        x = jnp.maximum(xu @ params[f"w{a}"].T + params[f"b{a}"], 0.0)
        x = jnp.maximum(x @ params[f"w{b}"].T + params[f"b{b}"], 0.0)
        return x @ params[f"w{c}"].T + params[f"b{c}"]

    return head(1, 2, 3), head(4, 5, 6)


if __name__ == "__main__":
    state_dim, action_dim = 24, 8
    hidden1, hidden2 = 32, 32
    batch = 8

    key = jax.random.PRNGKey(0)
    kp, ks, ka = jax.random.split(key, 3)
    params = init_td3_params(kp, state_dim, action_dim, hidden1, hidden2)
    packed = prepare_td3_params(params)          # one-time, outside forward path

    state = jax.random.normal(ks, (batch, state_dim), jnp.float32)
    action = jax.random.normal(ka, (batch, action_dim), jnp.float32)

    q1, q2 = td3_critic_forward(state, action, packed)
    jax.block_until_ready((q1, q2))

    r1, r2 = reference_forward(state, action, params)
    assert q1.shape == (batch, 1) and q2.shape == (batch, 1)
    np.testing.assert_allclose(np.asarray(q1), np.asarray(r1), rtol=1e-4, atol=1e-5)
    np.testing.assert_allclose(np.asarray(q2), np.asarray(r2), rtol=1e-4, atol=1e-5)

    print("KERNEL_OK")
</pallas_src>

<mosaic_0001>
module attributes {stable_mosaic.version = 11 : i64} {
  func.func @td3_critic_kernel(%arg0: i32, %arg1: memref<8x33xf32, #tpu.memory_space<vmem>>, %arg2: memref<33x65xf32, #tpu.memory_space<vmem>>, %arg3: memref<65x65xf32, #tpu.memory_space<vmem>>, %arg4: memref<65x2xf32, #tpu.memory_space<vmem>>, %arg5: memref<8x2xf32, #tpu.memory_space<vmem>>) attributes {dimension_semantics = [#tpu.dimension_semantics<parallel>], iteration_bounds = array<i64: 1>, scalar_prefetch = 0 : i64, scratch_operands = 0 : i64, tpu.core_type = #tpu.core_type<tc>, window_params = [{transform_indices = @transform_0, window_bounds = array<i64: 8, 33>}, {pipeline_mode = #tpu.pipeline_mode<synchronous>, transform_indices = @transform_1, window_bounds = array<i64: 33, 65>}, {pipeline_mode = #tpu.pipeline_mode<synchronous>, transform_indices = @transform_2, window_bounds = array<i64: 65, 65>}, {pipeline_mode = #tpu.pipeline_mode<synchronous>, transform_indices = @transform_3, window_bounds = array<i64: 65, 2>}, {transform_indices = @transform_4, window_bounds = array<i64: 8, 2>}]} {
    %c0 = arith.constant 0 : index
    %c0_0 = arith.constant 0 : index
    %0 = vector.load %arg1[%c0, %c0_0] : memref<8x33xf32, #tpu.memory_space<vmem>>, vector<8x33xf32>
    %c0_1 = arith.constant 0 : index
    %c0_2 = arith.constant 0 : index
    %1 = vector.load %arg2[%c0_1, %c0_2] : memref<33x65xf32, #tpu.memory_space<vmem>>, vector<33x65xf32>
    %cst = arith.constant dense<0.000000e+00> : vector<8x65xf32>
    %2 = tpu.matmul %0, %1, %cst {dimension_numbers = #tpu.dot_dimension_numbers<[1], [0], [0], [1], [0, 0, 1, 1], [], []>} : vector<8x33xf32>, vector<33x65xf32>, vector<8x65xf32> -> vector<8x65xf32>
    %cst_3 = arith.constant 0.000000e+00 : f32
    %3 = vector.broadcast %cst_3 : f32 to vector<8x65xf32>
    %4 = arith.maximumf %2, %3 : vector<8x65xf32>
    %c0_4 = arith.constant 0 : index
    %c0_5 = arith.constant 0 : index
    %5 = vector.load %arg3[%c0_4, %c0_5] : memref<65x65xf32, #tpu.memory_space<vmem>>, vector<65x65xf32>
    %cst_6 = arith.constant dense<0.000000e+00> : vector<8x65xf32>
    %6 = tpu.matmul %4, %5, %cst_6 {dimension_numbers = #tpu.dot_dimension_numbers<[1], [0], [0], [1], [0, 0, 1, 1], [], []>} : vector<8x65xf32>, vector<65x65xf32>, vector<8x65xf32> -> vector<8x65xf32>
    %cst_7 = arith.constant 0.000000e+00 : f32
    %7 = vector.broadcast %cst_7 : f32 to vector<8x65xf32>
    %8 = arith.maximumf %6, %7 : vector<8x65xf32>
    %c0_8 = arith.constant 0 : index
    %c0_9 = arith.constant 0 : index
    %9 = vector.load %arg4[%c0_8, %c0_9] : memref<65x2xf32, #tpu.memory_space<vmem>>, vector<65x2xf32>
    %cst_10 = arith.constant dense<0.000000e+00> : vector<8x2xf32>
    %10 = tpu.matmul %8, %9, %cst_10 {dimension_numbers = #tpu.dot_dimension_numbers<[1], [0], [0], [1], [0, 0, 1, 1], [], []>} : vector<8x65xf32>, vector<65x2xf32>, vector<8x2xf32> -> vector<8x2xf32>
    %c0_11 = arith.constant 0 : index
    %c0_12 = arith.constant 0 : index
    %11 = vector.load %arg5[%c0_11, %c0_12] : memref<8x2xf32, #tpu.memory_space<vmem>>, vector<8x2xf32>
    tpu.vector_store %arg5[%c0_11, %c0_12], %10 {strides = array<i32>} : memref<8x2xf32, #tpu.memory_space<vmem>>, vector<8x2xf32>,
    return
  }
  func.func @transform_0(%arg0: i32) -> (i32, i32) {
    %c0_i32 = arith.constant 0 : i32
    %c0_i32_0 = arith.constant 0 : i32
    return %arg0, %c0_i32 : i32, i32
  }
  func.func @transform_1(%arg0: i32) -> (i32, i32) {
    %c0_i32 = arith.constant 0 : i32
    %c0_i32_0 = arith.constant 0 : i32
    %c0_i32_1 = arith.constant 0 : i32
    return %c0_i32, %c0_i32_0 : i32, i32
  }
  func.func @transform_2(%arg0: i32) -> (i32, i32) {
    %c0_i32 = arith.constant 0 : i32
    %c0_i32_0 = arith.constant 0 : i32
    %c0_i32_1 = arith.constant 0 : i32
    return %c0_i32, %c0_i32_0 : i32, i32
  }
  func.func @transform_3(%arg0: i32) -> (i32, i32) {
    %c0_i32 = arith.constant 0 : i32
    %c0_i32_0 = arith.constant 0 : i32
    %c0_i32_1 = arith.constant 0 : i32
    return %c0_i32, %c0_i32_0 : i32, i32
  }
  func.func @transform_4(%arg0: i32) -> (i32, i32) {
    %c0_i32 = arith.constant 0 : i32
    %c0_i32_0 = arith.constant 0 : i32
    return %arg0, %c0_i32 : i32, i32
  }
}

</mosaic_0001>

<bundles_post_ra>
// kernel: tpu_custom_call.1
= control target key start
LH: loop header
LB: loop body
LE: loop exit
PB: predicated region body
PF: predicated region fallthrough
CT: control target
= control target key end

     0   :  { %9 = vsyncpa [#allocation3], 0  ;;  %s319_s0 = inlined_call_operand.hbm [shape: f32[8,33], index: 0, kind: input, shape index: {}]   ;;  %s320_s1 = inlined_call_operand.hbm [shape: f32[33,65], index: 1, kind: input, shape index: {}]   ;;  %s321_s2 = inlined_call_operand.vmem [shape: f32[65,65], index: 2, kind: input, shape index: {}]   ;;  %s322_s3 = inlined_call_operand.vmem [shape: f32[65,2], index: 3, kind: input, shape index: {}]   ;;  %s323_s4 = inlined_call_operand.vmem [shape: f32[8,2], index: 4, kind: output, shape index: {}]  }
   0x1   :  { %s16_s17 = sshll.u32 %s319_s0, 4  ;;  %s17_s17 = int_to_ptr.hbm [resolvable:$true] %s16_s17 }
   0x2   :  { %10 = vsyncpa [#allocation5], 0  ;;  %s224_s18 = smov [#allocation2]   ;;  %s26_s22 = sshll.u32 %s320_s1, 4  ;;  %s27_s22 = int_to_ptr.hbm [resolvable:$true] %s26_s22 }
   0x3   :  { %s18_s19 = sshll.u32 %s224_s18, 4  ;;  %s225_s23 = smov [#allocation4]   ;;  %s19_s19 = int_to_ptr.vmem [resolvable:$true] %s18_s19 }
   0x4   :  { %21 = dma.hbm_to_vmem [thread:$0]  %s17_s17, 128, %s19_s19, [#allocation3]  }
   0x5   :  { %s28_s24 = sshll.u32 %s225_s23, 4  ;;  %s226_s25 = smov 128   ;;  %s29_s24 = int_to_ptr.vmem [resolvable:$true] %s28_s24 }
   0x6   :  { %s227_s26 = smov 8  }
   0x7   :  { %34 = dma.hbm_to_vmem [thread:$0]  %s27_s22, 640, %s29_s24, [#allocation5], %s226_s25, %s226_s25, %s227_s26  }
   0x8   :  { %220 = dma.done.wait [#allocation3], 128  }
   0x9   :  { %221 = vsyncadd [#allocation3], 4294967168 }
   0xa   :  { %222 = dma.done.wait [#allocation5], 640  }
   0xb   :  { %223 = vsyncadd [#allocation5], 4294966656  ;;  %vm57_vm0 = vcmask 1040384   ;;  %v52_v0 = vld [vmem:[#allocation4 + $0x20] sm:$0x1]  ;;  %v51_v1 = vld [vmem:[#allocation4 + $0x18] sm:$0xff] }
   0xc   :  { %162 = vmatpush.msk.msra.mxu0 %vm57_vm0, %v52_v0  ;;  %v50_v2 = vld [vmem:[#allocation4 + $0x10] sm:$0xff]  ;;  %v90_v3 = vld [vmem:[%s321_s2 + $0x40] sm:$0x1]  ;;  %v49_v5 = vld [vmem:[#allocation4 + $0x8] sm:$0xff]  ;;  %vm53_vm1 = vcmask 269312   ;;  %vm91_vm2 = vcmask 531456  }
   0xd   :  { %v89_v4 = vld [vmem:[%s321_s2 + $0x38] sm:$0xff]  ;;  %164 = vmatpush.msk.msra.mxu1 %vm57_vm0, %v90_v3  ;;  %v88_v6 = vld [vmem:[%s321_s2 + $0x30] sm:$0xff]  ;;  %v48_v7 = vld [vmem:[#allocation4] sm:$0xff]  ;;  %vm154_vm3 = vcmask 15360  }
   0xe   :  { %73 = vmatpush.msra.mxu0 %v51_v1  ;;  %v87_v8 = vld [vmem:[%s321_s2 + $0x28] sm:$0xff]  ;;  %v47_v9 = vld [vmem:[#allocation2] sm:$0xff]  ;;  %v85_v11 = vld [vmem:[%s321_s2 + $0x18] sm:$0xff] }
   0xf   :  { %106 = vmatpush.msra.mxu1 %v89_v4  ;;  %v86_v10 = vld [vmem:[%s321_s2 + $0x20] sm:$0xff]  ;;  %v84_v12 = vld [vmem:[%s321_s2 + $0x10] sm:$0xff]  ;;  %v83_v13 = vld [vmem:[%s321_s2 + $0x8] sm:$0xff] }
  0x10   :  { %74 = vmatpush.msra.mxu0 %v50_v2  ;;  %v82_v14 = vld [vmem:[%s321_s2] sm:$0xff]  ;;  %v126_v16 = vld [vmem:[%s322_s3 + $0x38] sm:$0xff]  ;;  %v125_v17 = vld [vmem:[%s322_s3 + $0x30] sm:$0xff] }
  0x11   :  { %107 = vmatpush.msra.mxu1 %v88_v6  ;;  %v127_v15 = vld [vmem:[%s322_s3 + $0x40] sm:$0x1]  ;;  %v124_v18 = vld [vmem:[%s322_s3 + $0x28] sm:$0xff]  ;;  %v122_v20 = vld [vmem:[%s322_s3 + $0x18] sm:$0xff] }
  0x12   :  { %75 = vmatpush.msra.mxu0 %v49_v5  ;;  %166 = vmatpush.msk.msra.mxu2 %vm57_vm0, %v127_v15  ;;  %v123_v19 = vld [vmem:[%s322_s3 + $0x20] sm:$0xff]  ;;  %v121_v21 = vld [vmem:[%s322_s3 + $0x10] sm:$0xff]  ;;  %v120_v24 = vld [vmem:[%s322_s3 + $0x8] sm:$0xff] }
  0x13   :  { %108 = vmatpush.msra.mxu1 %v87_v8  ;;  %v119_v25 = vld [vmem:[%s322_s3] sm:$0xff] }
  0x14   :  { %76 = vmatpush.msra.mxu0 %v48_v7  ;;  %142 = vmatpush.msra.mxu2 %v126_v16 }
  0x15   :  { %163 = vmatmul.msk.f32.vlgmr.msra.gmra.mxu0 %vm53_vm1, %v47_v9  ;;  %109 = vmatpush.msra.mxu1 %v86_v10 }
  0x16   :  { %143 = vmatpush.msra.mxu2 %v125_v17 }
  0x17   :  { %110 = vmatpush.msra.mxu1 %v85_v11 }
  0x18   :  { %144 = vmatpush.msra.mxu2 %v124_v18 }
  0x19   :  { %111 = vmatpush.msra.mxu1 %v84_v12 }
  0x1a   :  { %145 = vmatpush.msra.mxu2 %v123_v19 }
  0x1b   :  { %112 = vmatpush.msra.mxu1 %v83_v13 }
  0x1c   :  { %146 = vmatpush.msra.mxu2 %v122_v20 }
  0x1d   :  { %113 = vmatpush.msra.mxu1 %v82_v14 }
  0x1e   :  { %147 = vmatpush.msra.mxu2 %v121_v21 }
  0x20   :  { %148 = vmatpush.msra.mxu2 %v120_v24 }
  0x22   :  { %149 = vmatpush.msra.mxu2 %v119_v25 }
  0x92   :  { %v78_v22 = vpop.f32.mrf.mxu0 }
  0x93   :  { %v81_v23 = vmax.f32 %v78_v22, 0.0 }
  0x95   :  { %165 = vmatmul.msk.f32.vlgmr.msra.gmra.mxu1 %vm91_vm2, %v81_v23 }
 0x112   :  { %v115_v26 = vpop.f32.mrf.mxu1 }
 0x113   :  { %v118_v27 = vmax.f32 %v115_v26, 0.0 }
 0x115   :  { %167 = vmatmul.msk.f32.vlgmr.msra.gmra.mxu2 %vm91_vm2, %v118_v27 }
 0x198   :  { %v151_v28 = vpop.f32.mrf.mxu2 }
 0x199   :  { %155 = vst.msk [vmem:[%s323_s4] sm:$0xff] %vm154_vm3, %v151_v28 }
 0x19a   :  { %160 = vsyncpa [#allocation3], 1 }
 0x19b   :  { %161 = vsyncpa [#allocation5], 1 }

</bundles_post_ra>
